<compile_context>
chip_gen: v6e
topology: v6e:2x2x1
jax: 0.10.0
libtpu: 0.0.40
codegen_flags: <defaults>
</compile_context>

<pallas_src>
import functools

import jax
import jax.numpy as jnp
from jax.experimental import pallas as pl
from jax.experimental.pallas import tpu as pltpu


_LANE = 128
_NEG_BIG = -1e30  # fill for padded logit lanes; exp(-1e30 - max) == 0 in f32


def _round_up(n, m):
    return ((n + m - 1) // m) * m


# ------------------------------ fused kernel ------------------------------- #

def _teacher_fused_kernel(*refs, n_layers):
    """refs = (x, w1, b1, ..., wN, bN, mid1, ..., midN, probs)."""
    x_ref = refs[0]
    wb_refs = refs[1:1 + 2 * n_layers]
    mid_refs = refs[1 + 2 * n_layers:1 + 3 * n_layers]
    prob_ref = refs[1 + 3 * n_layers]

    h = x_ref[...]
    for i in range(n_layers):
        w = wb_refs[2 * i][...]
        b = wb_refs[2 * i + 1][...]              # (1, Dout_pad) -> broadcasts over B
        z = jnp.dot(h, w, preferred_element_type=jnp.float32) + b
        if i < n_layers - 1:
            z = jnp.maximum(z, 0.0)              # ReLU (padded lanes stay exactly 0)
        mid_refs[i][...] = z.astype(mid_refs[i].dtype)
        h = z                                    # stays resident in VMEM / vregs

    # Numerically stable softmax over the (padded) class axis; padded lanes hold
    # a -1e30 bias so they contribute exp(...) == 0 and do not affect max/sum.
    m = jnp.max(h, axis=-1, keepdims=True)
    e = jnp.exp(h - m)
    denom = jnp.sum(e, axis=-1, keepdims=True)
    prob_ref[...] = (e * pl.reciprocal(denom, approx=True)).astype(prob_ref.dtype)


# ------------------------------ param helpers ------------------------------- #

def init_teacher_params(key, input_dim, n_classes=2, output_dim_list=(256, 64)):
    """Deterministic init, PyTorch-Linear-style uniform(-1/sqrt(fan_in), +)."""
    dims = [input_dim] + list(output_dim_list) + [n_classes]
    params = []
    for i in range(len(dims) - 1):
        key, kw, kb = jax.random.split(key, 3)
        fan_in, fan_out = dims[i], dims[i + 1]
        bound = 1.0 / (fan_in ** 0.5)
        w = jax.random.uniform(kw, (fan_in, fan_out), jnp.float32, -bound, bound)
        b = jax.random.uniform(kb, (1, fan_out), jnp.float32, -bound, bound)
        params.append((w, b))
    return params


def pad_teacher_params(params):
    """Zero-pad every layer's output width (and the next layer's input rows) up
    to a multiple of 128 lanes.  Padded lanes of the FINAL bias are -1e30 so the
    in-kernel softmax ignores them; padded hidden lanes stay exactly 0."""
    n_layers = len(params)
    padded = []
    prev_pad_in = params[0][0].shape[0]          # input_dim is left unpadded
    for i, (w, b) in enumerate(params):
        din, dout = w.shape
        dout_pad = _round_up(dout, _LANE)
        w_p = jnp.zeros((prev_pad_in, dout_pad), w.dtype).at[:din, :dout].set(w)
        fill = _NEG_BIG if i == n_layers - 1 else 0.0
        b_p = jnp.full((1, dout_pad), fill, b.dtype).at[:, :dout].set(b.reshape(1, -1))
        padded.append((w_p, b_p))
        prev_pad_in = dout_pad
    return padded


# ------------------------------ forward ------------------------------------- #

def teacher_forward(x, padded_params, out_dims):
    """Matches Teacher.forward: returns (middle_output_list, softmax(final))."""
    B = x.shape[0]
    n_layers = len(padded_params)
    pad_dims = [w.shape[1] for (w, _) in padded_params]

    flat_inputs = [x]
    for w, b in padded_params:
        flat_inputs += [w, b]

    vmem = functools.partial(pl.BlockSpec, memory_space=pltpu.MemorySpace.VMEM)
    out_shape = tuple(jax.ShapeDtypeStruct((B, d), jnp.float32) for d in pad_dims)
    out_shape = out_shape + (jax.ShapeDtypeStruct((B, pad_dims[-1]), jnp.float32),)

    outs = pl.pallas_call(
        functools.partial(_teacher_fused_kernel, n_layers=n_layers),
        out_shape=out_shape,
        in_specs=[vmem() for _ in flat_inputs],
        out_specs=tuple(vmem() for _ in out_shape),
    )(*flat_inputs)

    mids_padded, probs_padded = list(outs[:n_layers]), outs[n_layers]
    middle_output_list = [m[:, :d] for m, d in zip(mids_padded, out_dims)]
    y = probs_padded[:, :out_dims[-1]]
    return middle_output_list, y


# ------------------------------ main ----------------------------------------- #

if __name__ == "__main__":
    key = jax.random.PRNGKey(0)
    k_x, k_p = jax.random.split(key)

    batch = 8
    input_dim = 32
    n_classes = 2
    output_dim_list = [256, 64]

    x = jax.random.normal(k_x, (batch, input_dim), dtype=jnp.float32)
    params = init_teacher_params(k_p, input_dim, n_classes, output_dim_list)
    out_dims = [w.shape[1] for (w, _) in params]          # [256, 64, n_classes]
    padded_params = pad_teacher_params(params)

    middle_outputs, y = teacher_forward(x, padded_params, out_dims)
    jax.block_until_ready(y)
    for m in middle_outputs:
        jax.block_until_ready(m)

    # sanity checks against a plain-JAX reference
    ref = x
    ref_mid = []
    for i, (w, b) in enumerate(params):
        ref = ref @ w + b
        if i < len(params) - 1:
            ref = jnp.maximum(ref, 0.0)
        ref_mid.append(ref)
    ref_y = jax.nn.softmax(ref, axis=-1)

    assert y.shape == (batch, n_classes)
    assert [tuple(m.shape) for m in middle_outputs] == [
        (batch, 256), (batch, 64), (batch, n_classes)]
    for got, want in zip(middle_outputs, ref_mid):
        assert jnp.allclose(got, want, atol=5e-4), float(jnp.max(jnp.abs(got - want)))
    # probs tolerance is loosened slightly for the approximate EUP reciprocal
    assert jnp.allclose(y, ref_y, atol=2e-3)
    assert jnp.allclose(jnp.sum(y, axis=-1), 1.0, atol=2e-3)

    print("KERNEL_OK")
</pallas_src>

<mosaic_0001>
module attributes {stable_mosaic.version = 11 : i64} {
  func.func @_teacher_fused_kernel(%arg0: memref<8x32xf32, #tpu.memory_space<vmem>>, %arg1: memref<32x256xf32, #tpu.memory_space<vmem>>, %arg2: memref<1x256xf32, #tpu.memory_space<vmem>>, %arg3: memref<256x128xf32, #tpu.memory_space<vmem>>, %arg4: memref<1x128xf32, #tpu.memory_space<vmem>>, %arg5: memref<128x128xf32, #tpu.memory_space<vmem>>, %arg6: memref<1x128xf32, #tpu.memory_space<vmem>>, %arg7: memref<8x256xf32, #tpu.memory_space<vmem>>, %arg8: memref<8x128xf32, #tpu.memory_space<vmem>>, %arg9: memref<8x128xf32, #tpu.memory_space<vmem>>, %arg10: memref<8x128xf32, #tpu.memory_space<vmem>>) attributes {dimension_semantics = [], scalar_prefetch = 0 : i64, scratch_operands = 0 : i64, tpu.core_type = #tpu.core_type<tc>} {
    %c0 = arith.constant 0 : index
    %c0_0 = arith.constant 0 : index
    %0 = vector.load %arg0[%c0, %c0_0] : memref<8x32xf32, #tpu.memory_space<vmem>>, vector<8x32xf32>
    %c0_1 = arith.constant 0 : index
    %c0_2 = arith.constant 0 : index
    %1 = vector.load %arg1[%c0_1, %c0_2] : memref<32x256xf32, #tpu.memory_space<vmem>>, vector<32x256xf32>
    %c0_3 = arith.constant 0 : index
    %c0_4 = arith.constant 0 : index
    %2 = vector.load %arg2[%c0_3, %c0_4] : memref<1x256xf32, #tpu.memory_space<vmem>>, vector<1x256xf32>
    %cst = arith.constant dense<0.000000e+00> : vector<8x256xf32>
    %3 = tpu.matmul %0, %1, %cst {dimension_numbers = #tpu.dot_dimension_numbers<[1], [0], [0], [1], [0, 0, 1, 1], [], []>} : vector<8x32xf32>, vector<32x256xf32>, vector<8x256xf32> -> vector<8x256xf32>
    %4 = vector.broadcast %2 : vector<1x256xf32> to vector<8x256xf32>
    %5 = arith.addf %3, %4 : vector<8x256xf32>
    %cst_5 = arith.constant 0.000000e+00 : f32
    %6 = vector.broadcast %cst_5 : f32 to vector<8x256xf32>
    %7 = arith.maximumf %5, %6 : vector<8x256xf32>
    %c0_6 = arith.constant 0 : index
    %c0_7 = arith.constant 0 : index
    %8 = vector.load %arg7[%c0_6, %c0_7] : memref<8x256xf32, #tpu.memory_space<vmem>>, vector<8x256xf32>
    tpu.vector_store %arg7[%c0_6, %c0_7], %7 {strides = array<i32>} : memref<8x256xf32, #tpu.memory_space<vmem>>, vector<8x256xf32>,
    %c0_8 = arith.constant 0 : index
    %c0_9 = arith.constant 0 : index
    %9 = vector.load %arg3[%c0_8, %c0_9] : memref<256x128xf32, #tpu.memory_space<vmem>>, vector<256x128xf32>
    %c0_10 = arith.constant 0 : index
    %c0_11 = arith.constant 0 : index
    %10 = vector.load %arg4[%c0_10, %c0_11] : memref<1x128xf32, #tpu.memory_space<vmem>>, vector<1x128xf32>
    %cst_12 = arith.constant dense<0.000000e+00> : vector<8x128xf32>
    %11 = tpu.matmul %7, %9, %cst_12 {dimension_numbers = #tpu.dot_dimension_numbers<[1], [0], [0], [1], [0, 0, 1, 1], [], []>} : vector<8x256xf32>, vector<256x128xf32>, vector<8x128xf32> -> vector<8x128xf32>
    %12 = vector.broadcast %10 : vector<1x128xf32> to vector<8x128xf32>
    %13 = arith.addf %11, %12 : vector<8x128xf32>
    %cst_13 = arith.constant 0.000000e+00 : f32
    %14 = vector.broadcast %cst_13 : f32 to vector<8x128xf32>
    %15 = arith.maximumf %13, %14 : vector<8x128xf32>
    %c0_14 = arith.constant 0 : index
    %c0_15 = arith.constant 0 : index
    %16 = vector.load %arg8[%c0_14, %c0_15] : memref<8x128xf32, #tpu.memory_space<vmem>>, vector<8x128xf32>
    tpu.vector_store %arg8[%c0_14, %c0_15], %15 {strides = array<i32>} : memref<8x128xf32, #tpu.memory_space<vmem>>, vector<8x128xf32>,
    %c0_16 = arith.constant 0 : index
    %c0_17 = arith.constant 0 : index
    %17 = vector.load %arg5[%c0_16, %c0_17] : memref<128x128xf32, #tpu.memory_space<vmem>>, vector<128x128xf32>
    %c0_18 = arith.constant 0 : index
    %c0_19 = arith.constant 0 : index
    %18 = vector.load %arg6[%c0_18, %c0_19] : memref<1x128xf32, #tpu.memory_space<vmem>>, vector<1x128xf32>
    %cst_20 = arith.constant dense<0.000000e+00> : vector<8x128xf32>
    %19 = tpu.matmul %15, %17, %cst_20 {dimension_numbers = #tpu.dot_dimension_numbers<[1], [0], [0], [1], [0, 0, 1, 1], [], []>} : vector<8x128xf32>, vector<128x128xf32>, vector<8x128xf32> -> vector<8x128xf32>
    %20 = vector.broadcast %18 : vector<1x128xf32> to vector<8x128xf32>
    %21 = arith.addf %19, %20 : vector<8x128xf32>
    %c0_21 = arith.constant 0 : index
    %c0_22 = arith.constant 0 : index
    %22 = vector.load %arg9[%c0_21, %c0_22] : memref<8x128xf32, #tpu.memory_space<vmem>>, vector<8x128xf32>
    tpu.vector_store %arg9[%c0_21, %c0_22], %21 {strides = array<i32>} : memref<8x128xf32, #tpu.memory_space<vmem>>, vector<8x128xf32>,
    %cst_23 = arith.constant dense<0xFF800000> : vector<8xf32>
    %23 = vector.multi_reduction <maximumf>, %21, %cst_23 [1] : vector<8x128xf32> to vector<8xf32>
    %24 = vector.shape_cast %23 : vector<8xf32> to vector<8x1xf32>
    %25 = vector.broadcast %24 : vector<8x1xf32> to vector<8x128xf32>
    %26 = arith.subf %21, %25 : vector<8x128xf32>
    %27 = math.exp %26 : vector<8x128xf32>
    %cst_24 = arith.constant dense<0.000000e+00> : vector<8xf32>
    %28 = vector.multi_reduction <add>, %27, %cst_24 [1] : vector<8x128xf32> to vector<8xf32>
    %29 = vector.shape_cast %28 : vector<8xf32> to vector<8x1xf32>
    %30 = tpu.reciprocal %29 {approx = true} : vector<8x1xf32> -> vector<8x1xf32>
    %31 = vector.broadcast %30 : vector<8x1xf32> to vector<8x128xf32>
    %32 = arith.mulf %27, %31 : vector<8x128xf32>
    %c0_25 = arith.constant 0 : index
    %c0_26 = arith.constant 0 : index
    %33 = vector.load %arg10[%c0_25, %c0_26] : memref<8x128xf32, #tpu.memory_space<vmem>>, vector<8x128xf32>
    tpu.vector_store %arg10[%c0_25, %c0_26], %32 {strides = array<i32>} : memref<8x128xf32, #tpu.memory_space<vmem>>, vector<8x128xf32>,
    return
  }
}

</mosaic_0001>

<bundles_post_ra>
// kernel: tpu_custom_call.1
= control target key start
LH: loop header
LB: loop body
LE: loop exit
PB: predicated region body
PF: predicated region fallthrough
CT: control target
= control target key end

     0   :  { %16 = vsyncpa [#allocation3], 0  ;;  %s859_s0 = inlined_call_operand.hbm [shape: f32[8,32], index: 0, kind: input, shape index: {}]   ;;  %s860_s1 = inlined_call_operand.hbm [shape: f32[32,256], index: 1, kind: input, shape index: {}]   ;;  %s861_s2 = inlined_call_operand.vmem [shape: f32[1,256], index: 2, kind: input, shape index: {}]   ;;  %s862_s3 = inlined_call_operand.hbm [shape: f32[256,128], index: 3, kind: input, shape index: {}]   ;;  %s863_s4 = inlined_call_operand.vmem [shape: f32[1,128], index: 4, kind: input, shape index: {}]   ;;  %s864_s5 = inlined_call_operand.hbm [shape: f32[128,128], index: 5, kind: input, shape index: {}]   ;;  %s865_s6 = inlined_call_operand.vmem [shape: f32[1,128], index: 6, kind: input, shape index: {}]   ;;  %s866_s7 = inlined_call_operand.hbm [shape: f32[8,256], index: 7, kind: output, shape index: {0}]   ;;  %s867_s8 = inlined_call_operand.hbm [shape: f32[8,128], index: 8, kind: output, shape index: {1}]   ;;  %s868_s9 = inlined_call_operand.hbm [shape: f32[8,128], index: 9, kind: output, shape index: {2}]   ;;  %s869_s10 = inlined_call_operand.hbm [shape: f32[8,128], index: 10, kind: output, shape index: {3}]  }
   0x1   :  { %17 = vsyncpa [#allocation6], 0 }
   0x2   :  { %18 = vsyncpa [#allocation9], 0 }
   0x3   :  { %19 = vsyncpa [#allocation4], 0 }
   0x4   :  { %20 = vsyncpa [#allocation12], 0 }
   0x5   :  { %21 = vsyncpa [#allocation15], 0  ;;  %s739_s13 = smov [#allocation5]  }
   0x6   :  { %s37_s14 = sshll.u32 %s739_s13, 4  ;;  %s38_s14 = int_to_ptr.vmem [resolvable:$true] %s37_s14 }
   0x7   :  { %s575_s15 = scalar_lea.vmem %s38_s14, 1024  ;;  %p580_p1 = scmp.lt.s32.totalorder %s38_s14, %s38_s14 }
   0x8   :  { %p576_p0 = scmp.ne.s32.totalorder %s38_s14, %s575_s15  ;;  %p581_p2 = scmp.lt.s32.totalorder %s575_s15, %s575_s15 }
   0xa   :  { %p582_p3 = por %p581_p2, %p580_p1 }
   0xc   :  { %p583_p4 = pnand %p582_p3, %p576_p0 }
   0xe   :  { %586 = shalt.err (!%p583_p4)
}
   0xf   :  { %s740_s16 = smov 256   ;;  %s741_s17 = smov 16  }
  0x10   :  { %43 = dma.hbm_to_vmem [thread:$0]  %s860_s1, 1024, %s38_s14, [#allocation6], %s740_s16, %s740_s16, %s741_s17  }
  0x11   :  { %s742_s20 = smov [#allocation2]   ;;  %s743_s22 = smov [#allocation7]  }
  0x12   :  { %s28_s21 = sshll.u32 %s742_s20, 4  ;;  %s51_s23 = sshll.u32 %s743_s22, 4  ;;  %s29_s21 = int_to_ptr.vmem [resolvable:$true] %s28_s21  ;;  %s52_s23 = int_to_ptr.vmem [resolvable:$true] %s51_s23 }
  0x13   :  { %s595_s24 = scalar_lea.vmem %s29_s21, 128  ;;  %p600_p6 = scmp.lt.s32.totalorder %s29_s21, %s29_s21 }
  0x14   :  { %p596_p5 = scmp.ne.s32.totalorder %s29_s21, %s595_s24  ;;  %p601_p7 = scmp.lt.s32.totalorder %s595_s24, %s595_s24 }
  0x16   :  { %p602_p8 = por %p601_p7, %p600_p6 }
  0x18   :  { %p603_p9 = pnand %p602_p8, %p596_p5 }
  0x1a   :  { %606 = shalt.err (!%p603_p9)
}
  0x1b   :  { %31 = dma.hbm_to_vmem [thread:$0]  %s859_s0, 128, %s29_s21, [#allocation3]  }
  0x1c   :  { %s615_s27 = scalar_lea.vmem %s52_s23, 4096  ;;  %p620_p11 = scmp.lt.s32.totalorder %s52_s23, %s52_s23 }
  0x1d   :  { %p616_p10 = scmp.ne.s32.totalorder %s52_s23, %s615_s27  ;;  %p621_p12 = scmp.lt.s32.totalorder %s615_s27, %s615_s27 }
  0x1f   :  { %p622_p13 = por %p621_p12, %p620_p11 }
  0x21   :  { %p623_p0 = pnand %p622_p13, %p616_p10 }
  0x23   :  { %626 = shalt.err (!%p623_p0)
}
  0x24   :  { %s744_s1 = smov 128   ;;  %s745_s28 = smov 8  }
  0x25   :  { %57 = dma.hbm_to_vmem [thread:$0]  %s862_s3, 4096, %s52_s23, [#allocation6], %s744_s1, %s744_s1, %s745_s28  }
  0x26   :  { %s746_s11 = smov [#allocation8]  }
  0x27   :  { %s65_s12 = sshll.u32 %s746_s11, 4  ;;  %s66_s12 = int_to_ptr.vmem [resolvable:$true] %s65_s12 }
  0x28   :  { %s635_s13 = scalar_lea.vmem %s66_s12, 2048  ;;  %p640_p2 = scmp.lt.s32.totalorder %s66_s12, %s66_s12 }
  0x29   :  { %p636_p1 = scmp.ne.s32.totalorder %s66_s12, %s635_s13  ;;  %p641_p3 = scmp.lt.s32.totalorder %s635_s13, %s635_s13 }
  0x2b   :  { %p642_p4 = por %p641_p3, %p640_p2 }
  0x2d   :  { %p643_p5 = pnand %p642_p4, %p636_p1 }
  0x2f   :  { %646 = shalt.err (!%p643_p5)
}
  0x30   :  { %71 = dma.hbm_to_vmem [thread:$0]  %s864_s5, 2048, %s66_s12, [#allocation9], %s744_s1, %s744_s1, %s745_s28  }
  0x31   :  { %727 = dma.done.wait [#allocation3], 128  }
  0x32   :  { %728 = vsyncadd [#allocation3], 4294967168 }
  0x33   :  { %729 = dma.done.wait [#allocation6], 5120  }
  0x34   :  { %730 = vsyncadd [#allocation6], 4294962176 }
  0x35   :  { %731 = dma.done.wait [#allocation9], 2048  }
  0x36   :  { %732 = vsyncadd [#allocation9], 4294965248  ;;  %v747_v0 = vmov 0.0   ;;  %v94_v1 = vld [vmem:[#allocation5 + $0x38] sm:$0xff]  ;;  %v93_v2 = vld [vmem:[#allocation5 + $0x30] sm:$0xff]  ;;  %vm107_vm0 = vcmask 261120   ;;  %v97_v53 = vlaneseq }
  0x37   :  { %175 = vmatprep.mubr.f32.mxu0 %v747_v0  ;;  %v92_v3 = vld [vmem:[#allocation5 + $0x28] sm:$0xff]  ;;  %135 = vmatprep.subr.mxu0 %v94_v1  ;;  %v91_v4 = vld [vmem:[#allocation5 + $0x20] sm:$0xff]  ;;  %v90_v5 = vld [vmem:[#allocation5 + $0x18] sm:$0xff]  ;;  %vm748_vm1 = vmmov 0   ;;  %s750_s19 = smov [#allocation10]  }
  0x38   :  { %136 = vmatpush1.msra.mxu0 %v93_v2  ;;  %v89_v6 = vld [vmem:[#allocation5 + $0x10] sm:$0xff]  ;;  %v217_v7 = vld [vmem:[#allocation7 + $0xf8] sm:$0xff]  ;;  %v88_v10 = vld [vmem:[#allocation5 + $0x8] sm:$0xff]  ;;  %v98_v54 = vshrl.u32 %v97_v53, 7  ;;  %s407_s20 = sshll.u32 %s750_s19, 4  ;;  %s408_s20 = int_to_ptr.vmem [resolvable:$true] %s407_s20 }
  0x39   :  { %137 = vmatprep.subr.mxu0 %v92_v3  ;;  %v201_v8 = vld [vmem:[#allocation7 + $0x78] sm:$0xff]  ;;  %v216_v9 = vld [vmem:[#allocation7 + $0xf0] sm:$0xff]  ;;  %462 = vmatprep.subr.mxu1 %v217_v7  ;;  %v87_v12 = vld [vmem:[#allocation5] sm:$0xff] }
  0x3a   :  { %138 = vmatpush1.msra.mxu0 %v91_v4  ;;  %v200_v11 = vld [vmem:[#allocation7 + $0x70] sm:$0xff]  ;;  %463 = vmatpush3.msra.mxu1 %v201_v8  ;;  %v215_v13 = vld [vmem:[#allocation7 + $0xe8] sm:$0xff]  ;;  %v86_v14 = vld [vmem:[#allocation2] sm:$0xff]  ;;  %v99_v55 = vsub.s32 0, %v98_v54  ;;  %v103_v57 = vsub.s32 1, %v98_v54 }
  0x3b   :  { %139 = vmatprep.subr.mxu0 %v90_v5  ;;  %464 = vmatprep.subr.mxu1 %v216_v9  ;;  %v199_v15 = vld [vmem:[#allocation7 + $0x68] sm:$0xff]  ;;  %v214_v16 = vld [vmem:[#allocation7 + $0xe0] sm:$0xff]  ;;  %v213_v18 = vld [vmem:[#allocation7 + $0xd8] sm:$0xff] }
  0x3c   :  { %140 = vmatpush1.msra.mxu0 %v89_v6  ;;  %465 = vmatpush3.msra.mxu1 %v200_v11  ;;  %v198_v17 = vld [vmem:[#allocation7 + $0x60] sm:$0xff]  ;;  %v197_v19 = vld [vmem:[#allocation7 + $0x58] sm:$0xff]  ;;  %v212_v20 = vld [vmem:[#allocation7 + $0xd0] sm:$0xff] }
  0x3d   :  { %141 = vmatprep.subr.mxu0 %v88_v10  ;;  %466 = vmatprep.subr.mxu1 %v215_v13  ;;  %v196_v21 = vld [vmem:[#allocation7 + $0x50] sm:$0xff]  ;;  %v211_v22 = vld [vmem:[#allocation7 + $0xc8] sm:$0xff]  ;;  %v210_v24 = vld [vmem:[#allocation7 + $0xc0] sm:$0xff] }
  0x3e   :  { %142 = vmatpush1.msra.mxu0 %v87_v12  ;;  %467 = vmatpush3.msra.mxu1 %v199_v15  ;;  %v195_v23 = vld [vmem:[#allocation7 + $0x48] sm:$0xff]  ;;  %v194_v25 = vld [vmem:[#allocation7 + $0x40] sm:$0xff]  ;;  %v209_v26 = vld [vmem:[#allocation7 + $0xb8] sm:$0xff] }
  0x3f   :  { %459 = vmatmul.mubr.msk.f32.vlgmr.msra.gmra.mxu0 %vm107_vm0, %v86_v14  ;;  %468 = vmatprep.subr.mxu1 %v214_v16  ;;  %v193_v27 = vld [vmem:[#allocation7 + $0x38] sm:$0xff]  ;;  %v208_v28 = vld [vmem:[#allocation7 + $0xb0] sm:$0xff]  ;;  %v207_v30 = vld [vmem:[#allocation7 + $0xa8] sm:$0xff] }
  0x40   :  { %514 = vmatprep.subr.mxu0 %v747_v0  ;;  %469 = vmatpush3.msra.mxu1 %v198_v17  ;;  %v192_v29 = vld [vmem:[#allocation7 + $0x30] sm:$0xff]  ;;  %v191_v31 = vld [vmem:[#allocation7 + $0x28] sm:$0xff]  ;;  %v206_v32 = vld [vmem:[#allocation7 + $0xa0] sm:$0xff] }
  0x41   :  { %470 = vmatprep.subr.mxu1 %v213_v18  ;;  %v190_v33 = vld [vmem:[#allocation7 + $0x20] sm:$0xff]  ;;  %v205_v34 = vld [vmem:[#allocation7 + $0x98] sm:$0xff]  ;;  %v204_v36 = vld [vmem:[#allocation7 + $0x90] sm:$0xff]  ;;  %546 = vmatprep.mubr.msk.f32.mxu0 %vm748_vm1, %v747_v0 }
  0x42   :  { %471 = vmatpush3.msra.mxu1 %v197_v19  ;;  %v189_v35 = vld [vmem:[#allocation7 + $0x18] sm:$0xff]  ;;  %v188_v37 = vld [vmem:[#allocation7 + $0x10] sm:$0xff]  ;;  %v203_v38 = vld [vmem:[#allocation7 + $0x88] sm:$0xff] }
  0x43   :  { %472 = vmatprep.subr.mxu1 %v212_v20  ;;  %v187_v39 = vld [vmem:[#allocation7 + $0x8] sm:$0xff]  ;;  %v202_v40 = vld [vmem:[#allocation7 + $0x80] sm:$0xff]  ;;  %v312_v42 = vld [vmem:[#allocation8 + $0x78] sm:$0xff] }
  0x44   :  { %473 = vmatpush3.msra.mxu1 %v196_v21  ;;  %v186_v41 = vld [vmem:[#allocation7] sm:$0xff]  ;;  %v311_v43 = vld [vmem:[#allocation8 + $0x70] sm:$0xff]  ;;  %515 = vmatpush3.msra.mxu0 %v312_v42  ;;  %v310_v44 = vld [vmem:[#allocation8 + $0x68] sm:$0xff] }
  0x45   :  { %474 = vmatprep.subr.mxu1 %v211_v22  ;;  %516 = vmatprep.subr.mxu0 %v747_v0  ;;  %v309_v45 = vld [vmem:[#allocation8 + $0x60] sm:$0xff]  ;;  %v308_v46 = vld [vmem:[#allocation8 + $0x58] sm:$0xff]  ;;  %v307_v47 = vld [vmem:[#allocation8 + $0x50] sm:$0xff] }
  0x46   :  { %475 = vmatpush3.msra.mxu1 %v195_v23  ;;  %517 = vmatpush3.msra.mxu0 %v311_v43  ;;  %v306_v48 = vld [vmem:[#allocation8 + $0x48] sm:$0xff]  ;;  %v305_v49 = vld [vmem:[#allocation8 + $0x40] sm:$0xff]  ;;  %v304_v50 = vld [vmem:[#allocation8 + $0x38] sm:$0xff] }
  0x47   :  { %476 = vmatprep.subr.mxu1 %v210_v24  ;;  %518 = vmatprep.subr.mxu0 %v747_v0  ;;  %v303_v51 = vld [vmem:[#allocation8 + $0x30] sm:$0xff]  ;;  %v302_v52 = vld [vmem:[#allocation8 + $0x28] sm:$0xff]  ;;  %v95_v56 = vld [vmem:[%s861_s2] sm:$0x3] }
  0x48   :  { %477 = vmatpush3.msra.mxu1 %v194_v25  ;;  %519 = vmatpush3.msra.mxu0 %v310_v44  ;;  %v100_v58 = vrot.slane %v95_v56, %v99_v55  ;;  %v104_v59 = vrot.slane %v95_v56, %v103_v57  ;;  %v301_v3 = vld [vmem:[#allocation8 + $0x20] sm:$0xff]  ;;  %v300_v4 = vld [vmem:[#allocation8 + $0x18] sm:$0xff]  ;;  %v299_v5 = vld [vmem:[#allocation8 + $0x10] sm:$0xff] }
  0x49   :  { %478 = vmatprep.subr.mxu1 %v209_v26  ;;  %520 = vmatprep.subr.mxu0 %v747_v0  ;;  %v298_v6 = vld [vmem:[#allocation8 + $0x8] sm:$0xff]  ;;  %v297_v7 = vld [vmem:[#allocation8] sm:$0xff]  ;;  %v460_v9 = vld [vmem:[%s863_s4] ss:$0 sm:$0xff]  ;;  %s749_s4 = smov [#allocation11]  }
  0x4a   :  { %479 = vmatpush3.msra.mxu1 %v193_v27  ;;  %521 = vmatpush3.msra.mxu0 %v309_v45  ;;  %v461_v14 = vld [vmem:[%s865_s6] ss:$0 sm:$0xff]  ;;  %s417_s18 = sshll.u32 %s749_s4, 4  ;;  %s418_s18 = int_to_ptr.vmem [resolvable:$true] %s417_s18 }
  0x4b   :  { %480 = vmatprep.subr.mxu1 %v208_v28  ;;  %522 = vmatprep.subr.mxu0 %v747_v0  ;;  %s647_s21 = scalar_lea.vmem %s418_s18, 128  ;;  %p652_p7 = scmp.lt.s32.totalorder %s418_s18, %s418_s18 }
  0x4c   :  { %481 = vmatpush3.msra.mxu1 %v192_v29  ;;  %523 = vmatpush3.msra.mxu0 %v308_v46  ;;  %p648_p6 = scmp.ne.s32.totalorder %s418_s18, %s647_s21  ;;  %p653_p8 = scmp.lt.s32.totalorder %s647_s21, %s647_s21 }
  0x4d   :  { %482 = vmatprep.subr.mxu1 %v207_v30  ;;  %524 = vmatprep.subr.mxu0 %v747_v0 }
  0x4e   :  { %483 = vmatpush3.msra.mxu1 %v191_v31  ;;  %525 = vmatpush3.msra.mxu0 %v307_v47  ;;  %p654_p9 = por %p653_p8, %p652_p7 }
  0x4f   :  { %484 = vmatprep.subr.mxu1 %v206_v32  ;;  %526 = vmatprep.subr.mxu0 %v747_v0 }
  0x50   :  { %485 = vmatpush3.msra.mxu1 %v190_v33  ;;  %527 = vmatpush3.msra.mxu0 %v306_v48  ;;  %p655_p10 = pnand %p654_p9, %p648_p6 }
  0x51   :  { %486 = vmatprep.subr.mxu1 %v205_v34  ;;  %528 = vmatprep.subr.mxu0 %v747_v0 }
  0x52   :  { %487 = vmatpush3.msra.mxu1 %v189_v35  ;;  %529 = vmatpush3.msra.mxu0 %v305_v49 }
  0x53   :  { %488 = vmatprep.subr.mxu1 %v204_v36  ;;  %530 = vmatprep.subr.mxu0 %v747_v0 }
  0x54   :  { %489 = vmatpush3.msra.mxu1 %v188_v37  ;;  %531 = vmatpush3.msra.mxu0 %v304_v50 }
  0x55   :  { %490 = vmatprep.subr.mxu1 %v203_v38  ;;  %532 = vmatprep.subr.mxu0 %v747_v0 }
  0x56   :  { %491 = vmatpush3.msra.mxu1 %v187_v39  ;;  %533 = vmatpush3.msra.mxu0 %v303_v51 }
  0x57   :  { %492 = vmatprep.subr.mxu1 %v202_v40  ;;  %534 = vmatprep.subr.mxu0 %v747_v0 }
  0x58   :  { %493 = vmatpush3.msra.mxu1 %v186_v41  ;;  %535 = vmatpush3.msra.mxu0 %v302_v52 }
  0x59   :  { %536 = vmatprep.subr.mxu0 %v747_v0 }
  0x5a   :  { %537 = vmatpush3.msra.mxu0 %v301_v3 }
  0x5b   :  { %538 = vmatprep.subr.mxu0 %v747_v0 }
  0x5c   :  { %539 = vmatpush3.msra.mxu0 %v300_v4 }
  0x5d   :  { %540 = vmatprep.subr.mxu0 %v747_v0 }
  0x5e   :  { %541 = vmatpush3.msra.mxu0 %v299_v5 }
  0x5f   :  { %542 = vmatprep.subr.mxu0 %v747_v0 }
  0x60   :  { %543 = vmatpush3.msra.mxu0 %v298_v6 }
  0x61   :  { %544 = vmatprep.subr.mxu0 %v747_v0 }
  0x62   :  { %545 = vmatpush3.msra.mxu0 %v297_v7 }
  0xff   :  { %v177_v60 = vpop.f32.mrf.mxu0 }
 0x100   :  { %v178_v61 = vadd.f32 %v177_v60, %v100_v58 }
 0x101   :  { %v179_v62 = vpop.f32.mrf.mxu0 }
 0x102   :  { %v182_v63 = vmax.f32 %v178_v61, 0.0  ;;  %v180_v1 = vadd.f32 %v179_v62, %v104_v59 }
 0x104   :  { %184 = vst [vmem:[#allocation10] sm:$0xff] %v182_v63  ;;  %v183_v2 = vmax.f32 %v180_v1, 0.0 }
 0x106   :  { %185 = vst [vmem:[#allocation10 + $0x8] sm:$0xff] %v183_v2  ;;  %289 = vmatprep.mubr.f32.mxu1 %v183_v2 }
 0x107   :  { %290 = vmatmul.mubr.f32.vlgmr.msra.gmra.mxu1 %v182_v63 }
 0x1c7   :  { %v494_v8 = vpop.f32.mrf.mxu1 }
 0x1c9   :  { %v495_v10 = vpop.f32.mrf.mxu1 }
 0x1ca   :  { %v496_v11 = vadd.f32 %v495_v10, %v494_v8 }
 0x1cc   :  { %v292_v12 = vadd.f32 %v496_v11, %v460_v9 }
 0x1ce   :  { %v295_v13 = vmax.f32 %v292_v12, 0.0 }
 0x1d0   :  { %296 = vst [vmem:[#allocation11] sm:$0xff] %v295_v13  ;;  %547 = vmatmul.mubr.f32.vlgmr.msra.gmra.mxu0 %v295_v13 }
 0x290   :  { %v386_v15 = vpop.f32.mrf.mxu0 }
 0x291   :  { %v387_v16 = vadd.f32 %v461_v14, %v386_v15 }
 0x292   :  { %v548_v17 = vpop.f32.mrf.mxu0 }
 0x293   :  { %390 = vst [vmem:[#allocation13] sm:$0xff] %v387_v16  ;;  %391 = vmax.xlane.f32.xlu0 %v387_v16 }
 0x31c   :  { %v392_v0 = vpop.xlane.xlu0 %391 }
 0x31d   :  { %v393_v18 = vsub.f32 %v387_v16, %v392_v0 }
 0x31f   :  { %v394_v19 = vmul.f32 1.442695, %v393_v18 }
 0x321   :  { %563 = vpow2.f32 %v394_v19 }
 0x32e   :  { %v564_v20 = vpop.eup %563 }
 0x32f   :  { %396 = vadd.xlane.f32.xlu0 %v564_v20 }
 0x330   :  { %658 = shalt.err (!%p655_p10)
}
 0x331   :  { %420 = dma.vmem_to_hbm [thread:$0]  %s418_s18, 128, %s867_s8, [#allocation12]  }
 0x332   :  { %s667_s23 = scalar_lea.vmem %s408_s20, 256  ;;  %p672_p12 = scmp.lt.s32.totalorder %s408_s20, %s408_s20 }
 0x333   :  { %p668_p11 = scmp.ne.s32.totalorder %s408_s20, %s667_s23  ;;  %p673_p13 = scmp.lt.s32.totalorder %s667_s23, %s667_s23 }
 0x335   :  { %p674_p0 = por %p673_p13, %p672_p12 }
 0x337   :  { %p675_p1 = pnand %p674_p0, %p668_p11 }
 0x339   :  { %678 = shalt.err (!%p675_p1)
}
 0x33a   :  { %410 = dma.vmem_to_hbm [thread:$0]  %s408_s20, 256, %s866_s7, [#allocation4]  }
 0x33b   :  { %s751_s26 = smov [#allocation13]  }
 0x33c   :  { %s427_s27 = sshll.u32 %s751_s26, 4  ;;  %s428_s27 = int_to_ptr.vmem [resolvable:$true] %s427_s27 }
 0x33d   :  { %s687_s1 = scalar_lea.vmem %s428_s27, 128  ;;  %p692_p3 = scmp.lt.s32.totalorder %s428_s27, %s428_s27 }
 0x33e   :  { %p688_p2 = scmp.ne.s32.totalorder %s428_s27, %s687_s1  ;;  %p693_p4 = scmp.lt.s32.totalorder %s687_s1, %s687_s1 }
 0x340   :  { %p694_p5 = por %p693_p4, %p692_p3 }
 0x342   :  { %p695_p6 = pnand %p694_p5, %p688_p2 }
 0x344   :  { %698 = shalt.err (!%p695_p6)
}
 0x345   :  { %430 = dma.vmem_to_hbm [thread:$0]  %s428_s27, 128, %s868_s9, [#allocation12]  }
 0x346   :  { %s752_s29 = smov [#allocation14]  }
 0x347   :  { %s437_s30 = sshll.u32 %s752_s29, 4  ;;  %s438_s30 = int_to_ptr.vmem [resolvable:$true] %s437_s30 }
 0x348   :  { %s707_s7 = scalar_lea.vmem %s438_s30, 128  ;;  %p712_p8 = scmp.lt.s32.totalorder %s438_s30, %s438_s30 }
 0x349   :  { %p708_p7 = scmp.ne.s32.totalorder %s438_s30, %s707_s7  ;;  %p713_p9 = scmp.lt.s32.totalorder %s707_s7, %s707_s7 }
 0x34b   :  { %p714_p10 = por %p713_p9, %p712_p8 }
 0x34d   :  { %p715_p11 = pnand %p714_p10, %p708_p7 }
 0x3b8   :  { %v397_v21 = vpop.xlane.xlu0 %396 }
 0x3b9   :  { %565 = vrcp.f32 %v397_v21 }
 0x3c6   :  { %v566_v22 = vpop.eup %565 }
 0x3c7   :  { %v399_v23 = vmul.f32 %v566_v22, %v564_v20 }
 0x3c9   :  { %400 = vst [vmem:[#allocation14] sm:$0xff] %v399_v23 }
 0x3ca   :  { %718 = shalt.err (!%p715_p11)
}
 0x3cb   :  { %440 = dma.vmem_to_hbm [thread:$0]  %s438_s30, 128, %s869_s10, [#allocation15]  }
 0x3cc   :  { %733 = dma.done.wait [#allocation4], 256  }
 0x3cd   :  { %734 = vsyncadd [#allocation4], 4294967040 }
 0x3ce   :  { %735 = dma.done.wait [#allocation12], 256  }
 0x3cf   :  { %736 = vsyncadd [#allocation12], 4294967040 }
 0x3d0   :  { %737 = dma.done.wait [#allocation15], 128  }
 0x3d1   :  { %738 = vsyncadd [#allocation15], 4294967168 }
 0x3d2   :  { %453 = vsyncpa [#allocation3], 1 }
 0x3d3   :  { %454 = vsyncpa [#allocation6], 1 }
 0x3d4   :  { %455 = vsyncpa [#allocation9], 1 }
 0x3d5   :  { %456 = vsyncpa [#allocation4], 1 }
 0x3d6   :  { %457 = vsyncpa [#allocation12], 1 }
 0x3d7   :  { %458 = vsyncpa [#allocation15], 1 }

</bundles_post_ra>
